<compile_context>
chip_gen: v7x
topology: tpu7x:2x2x1
jax: 0.10.0
libtpu: 0.0.40
codegen_flags: <defaults>
</compile_context>

<pallas_src>
import functools

import jax
import jax.numpy as jnp
from jax.experimental import pallas as pl
from jax.experimental.pallas import tpu as pltpu

NEURON_CDECAY = 1.0 / 2.0
NEURON_VDECAY = 3.0 / 4.0
NEURON_VTH = 0.5

_LANE = 128
_SUBLANE = 8


def _pad_up(n, m):
    return ((n + m - 1) // m) * m


def _spike_mlp_lif_kernel(num_layers, spike_ts, x_ref, *refs):
    """Single invocation: layer-major LIF forward, statically unrolled.

    x_ref : (T*B_pad, D_in_pad) f32 time-major input spikes (t-major rows).
    refs  : [w0, b0, w1, b1, ..., wL, bL, out_ref]
            w_l: (fan_in_pad, fan_out_pad) f32, b_l: (1, fan_out_pad) f32,
            out_ref: (B_pad, out_pad) f32.
    """
    wb = refs[: 2 * num_layers]
    out_ref = refs[2 * num_layers]

    T = spike_ts
    TB = x_ref.shape[0]
    B = TB // T

    # Layer-0 drive input: all timesteps stacked along the M dimension.
    prev = x_ref[...]  # (T*B, D_in_pad)

    for l in range(num_layers):  # statically unrolled over layers
        w_ref = wb[2 * l]
        b_ref = wb[2 * l + 1]
        fan_out = w_ref.shape[1]

        # ONE MXU matmul covers this layer's synaptic drive for every timestep.
        # (Weights read directly at the use site; no hoisted SSA copies.)
        drive = (
            jnp.dot(prev, w_ref[...], preferred_element_type=jnp.float32)
            + b_ref[...]
        ).reshape(T, B, fan_out)

        cur = jnp.zeros((B, fan_out), jnp.float32)
        volt = jnp.zeros((B, fan_out), jnp.float32)
        spk = jnp.zeros((B, fan_out), jnp.float32)

        is_last = l == num_layers - 1
        acc = jnp.zeros((B, fan_out), jnp.float32)
        spikes_t = []

        for t in range(T):  # pure-VPU LIF scan, statically unrolled
            cur = cur * NEURON_CDECAY + drive[t]
            volt = volt * NEURON_VDECAY * (1.0 - spk) + cur
            spk = (volt > NEURON_VTH).astype(jnp.float32)  # PseudoSpikeRect fwd
            if is_last:
                acc = acc + spk
            else:
                spikes_t.append(spk)

        if is_last:
            out_ref[...] = acc * (1.0 / T)
        else:
            # Stack this layer's spikes back into the (T*B, fan_out) M-slab
            # that feeds the next layer's single batched matmul.
            prev = jnp.concatenate(spikes_t, axis=0)


def spike_mlp_lif(in_pop_spikes, weights, biases):
    """in_pop_spikes: (B, in_pop_dim, T) float32 spikes (PyTorch layout).
    weights[l]: (fan_in, fan_out) float32 (already transposed from PyTorch (out,in)).
    biases[l]:  (1, fan_out) float32.
    Returns (B, out_pop_dim) float32 == out_pop_act.
    """
    B, d_in, T = in_pop_spikes.shape
    num_layers = len(weights)
    out_dim = weights[-1].shape[1]

    # Lane-dense feature padding (multiples of 128) and sublane batch padding.
    dims = [d_in] + [w.shape[1] for w in weights]
    pdims = [_pad_up(d, _LANE) for d in dims]
    b_pad = _pad_up(B, _SUBLANE)

    # Time-major, padded, flattened to (T*B_pad, D_in_pad): single jnp.pad.
    x_tmajor = jnp.transpose(in_pop_spikes, (2, 0, 1)).astype(jnp.float32)
    x_flat = jnp.pad(
        x_tmajor, ((0, 0), (0, b_pad - B), (0, pdims[0] - d_in))
    ).reshape(T * b_pad, pdims[0])

    flat_params = []
    for l, (w, b) in enumerate(zip(weights, biases)):
        wp = jnp.pad(
            w.astype(jnp.float32),
            ((0, pdims[l] - w.shape[0]), (0, pdims[l + 1] - w.shape[1])),
        )
        bp = jnp.pad(b.astype(jnp.float32), ((0, 0), (0, pdims[l + 1] - b.shape[1])))
        flat_params += [wp, bp]

    kernel = functools.partial(_spike_mlp_lif_kernel, num_layers, T)

    vmem_spec = pl.BlockSpec(memory_space=pltpu.MemorySpace.VMEM)
    # Gridless: everything (input slab + weights, well under 1 MiB here) is
    # VMEM-resident for the whole kernel; nothing is double-buffered.
    out_pad = pl.pallas_call(
        kernel,
        out_shape=jax.ShapeDtypeStruct((b_pad, pdims[-1]), jnp.float32),
        in_specs=[vmem_spec] * (1 + 2 * num_layers),
        out_specs=vmem_spec,
    )(x_flat, *flat_params)

    # Strip batch/lane padding back off.
    return out_pad[:B, :out_dim]


def _reference_lif(in_pop_spikes, weights, biases):
    """Pure-JAX replica of the PyTorch LIF forward for verification."""
    B, _, T = in_pop_spikes.shape
    num_layers = len(weights)
    cur = [jnp.zeros((B, w.shape[1]), jnp.float32) for w in weights]
    volt = [jnp.zeros((B, w.shape[1]), jnp.float32) for w in weights]
    spk = [jnp.zeros((B, w.shape[1]), jnp.float32) for w in weights]
    act = jnp.zeros((B, weights[-1].shape[1]), jnp.float32)
    for t in range(T):
        x = in_pop_spikes[:, :, t]
        for l in range(num_layers):
            cur[l] = cur[l] * NEURON_CDECAY + x @ weights[l] + biases[l]
            volt[l] = volt[l] * NEURON_VDECAY * (1.0 - spk[l]) + cur[l]
            spk[l] = (volt[l] > NEURON_VTH).astype(jnp.float32)
            x = spk[l]
        act = act + x
    return act / T


def _init_linear(key, fan_in, fan_out):
    """Deterministic PyTorch-style nn.Linear init: U(-1/sqrt(fan_in), 1/sqrt(fan_in))."""
    kw, kb = jax.random.split(key)
    bound = 1.0 / jnp.sqrt(jnp.float32(fan_in))
    w = jax.random.uniform(kw, (fan_in, fan_out), jnp.float32, -bound, bound)
    b = jax.random.uniform(kb, (1, fan_out), jnp.float32, -bound, bound)
    return w, b


if __name__ == "__main__":
    # Small shapes consistent with SpikeMLP('LIF'): in_pop_dim=32, hidden=[64,32],
    # out_pop_dim=16, spike_ts=8, batch=8.
    batch = 8
    in_pop_dim = 32
    hidden_sizes = [64, 32]
    out_pop_dim = 16
    spike_ts = 8

    key = jax.random.PRNGKey(0)
    k_in, *k_layers = jax.random.split(key, 2 + len(hidden_sizes))

    layer_dims = [in_pop_dim] + hidden_sizes + [out_pop_dim]
    weights, biases = [], []
    for i, kl in enumerate(k_layers):
        w, b = _init_linear(kl, layer_dims[i], layer_dims[i + 1])
        weights.append(w)
        biases.append(b)

    # Input population spikes in {0,1}, PyTorch layout (B, in_pop_dim, spike_ts).
    in_pop_spikes = jax.random.bernoulli(
        jax.random.PRNGKey(42), 0.5, (batch, in_pop_dim, spike_ts)
    ).astype(jnp.float32)

    out = spike_mlp_lif(in_pop_spikes, weights, biases)
    out = jax.block_until_ready(out)

    ref = _reference_lif(in_pop_spikes, weights, biases)
    assert out.shape == (batch, out_pop_dim)
    # Spikes are binary, so any mismatch from a borderline `> VTH` flip would
    # show up as a multiple of 1/spike_ts, not a tolerance issue; padded
    # rows/columns contribute exact zeros so the math is unchanged.
    assert jnp.allclose(out, ref, atol=1e-5, rtol=1e-5), "mismatch vs reference"

    print("KERNEL_OK")
</pallas_src>

<mosaic_0001>
module attributes {stable_mosaic.version = 11 : i64} {
  func.func @_spike_mlp_lif_kernel(%arg0: memref<64x128xf32, #tpu.memory_space<vmem>>, %arg1: memref<128x128xf32, #tpu.memory_space<vmem>>, %arg2: memref<1x128xf32, #tpu.memory_space<vmem>>, %arg3: memref<128x128xf32, #tpu.memory_space<vmem>>, %arg4: memref<1x128xf32, #tpu.memory_space<vmem>>, %arg5: memref<128x128xf32, #tpu.memory_space<vmem>>, %arg6: memref<1x128xf32, #tpu.memory_space<vmem>>, %arg7: memref<8x128xf32, #tpu.memory_space<vmem>>) attributes {dimension_semantics = [], scalar_prefetch = 0 : i64, scratch_operands = 0 : i64, tpu.core_type = #tpu.core_type<tc>} {
    %c0 = arith.constant 0 : index
    %c0_0 = arith.constant 0 : index
    %0 = vector.load %arg0[%c0, %c0_0] : memref<64x128xf32, #tpu.memory_space<vmem>>, vector<64x128xf32>
    %c0_1 = arith.constant 0 : index
    %c0_2 = arith.constant 0 : index
    %1 = vector.load %arg1[%c0_1, %c0_2] : memref<128x128xf32, #tpu.memory_space<vmem>>, vector<128x128xf32>
    %cst = arith.constant dense<0.000000e+00> : vector<64x128xf32>
    %2 = tpu.matmul %0, %1, %cst {dimension_numbers = #tpu.dot_dimension_numbers<[1], [0], [0], [1], [0, 0, 1, 1], [], []>} : vector<64x128xf32>, vector<128x128xf32>, vector<64x128xf32> -> vector<64x128xf32>
    %c0_3 = arith.constant 0 : index
    %c0_4 = arith.constant 0 : index
    %3 = vector.load %arg2[%c0_3, %c0_4] : memref<1x128xf32, #tpu.memory_space<vmem>>, vector<1x128xf32>
    %4 = vector.broadcast %3 : vector<1x128xf32> to vector<64x128xf32>
    %5 = arith.addf %2, %4 : vector<64x128xf32>
    %6 = vector.shape_cast %5 : vector<64x128xf32> to vector<8x8x128xf32>
    %cst_5 = arith.constant 0.000000e+00 : f32
    %7 = vector.broadcast %cst_5 : f32 to vector<8x128xf32>
    %cst_6 = arith.constant 0.000000e+00 : f32
    %8 = vector.broadcast %cst_6 : f32 to vector<8x128xf32>
    %cst_7 = arith.constant 0.000000e+00 : f32
    %9 = vector.broadcast %cst_7 : f32 to vector<8x128xf32>
    %cst_8 = arith.constant 5.000000e-01 : f32
    %10 = vector.broadcast %cst_8 : f32 to vector<8x128xf32>
    %11 = arith.mulf %7, %10 : vector<8x128xf32>
    %12 = vector.extract_strided_slice %6 {offsets = [0, 0, 0], sizes = [1, 8, 128], strides = [1, 1, 1]} : vector<8x8x128xf32> to vector<1x8x128xf32>
    %13 = vector.shape_cast %12 : vector<1x8x128xf32> to vector<8x128xf32>
    %14 = arith.addf %11, %13 : vector<8x128xf32>
    %cst_9 = arith.constant 7.500000e-01 : f32
    %15 = vector.broadcast %cst_9 : f32 to vector<8x128xf32>
    %16 = arith.mulf %8, %15 : vector<8x128xf32>
    %cst_10 = arith.constant 1.000000e+00 : f32
    %17 = vector.broadcast %cst_10 : f32 to vector<8x128xf32>
    %18 = arith.subf %17, %9 : vector<8x128xf32>
    %19 = arith.mulf %16, %18 : vector<8x128xf32>
    %20 = arith.addf %19, %14 : vector<8x128xf32>
    %cst_11 = arith.constant 5.000000e-01 : f32
    %21 = vector.broadcast %cst_11 : f32 to vector<8x128xf32>
    %22 = arith.cmpf ogt, %20, %21 : vector<8x128xf32>
    %23 = arith.extui %22 : vector<8x128xi1> to vector<8x128xi32>
    %24 = arith.sitofp %23 : vector<8x128xi32> to vector<8x128xf32>
    %cst_12 = arith.constant 5.000000e-01 : f32
    %25 = vector.broadcast %cst_12 : f32 to vector<8x128xf32>
    %26 = arith.mulf %14, %25 : vector<8x128xf32>
    %27 = vector.extract_strided_slice %6 {offsets = [1, 0, 0], sizes = [1, 8, 128], strides = [1, 1, 1]} : vector<8x8x128xf32> to vector<1x8x128xf32>
    %28 = vector.shape_cast %27 : vector<1x8x128xf32> to vector<8x128xf32>
    %29 = arith.addf %26, %28 : vector<8x128xf32>
    %cst_13 = arith.constant 7.500000e-01 : f32
    %30 = vector.broadcast %cst_13 : f32 to vector<8x128xf32>
    %31 = arith.mulf %20, %30 : vector<8x128xf32>
    %cst_14 = arith.constant 1.000000e+00 : f32
    %32 = vector.broadcast %cst_14 : f32 to vector<8x128xf32>
    %33 = arith.subf %32, %24 : vector<8x128xf32>
    %34 = arith.mulf %31, %33 : vector<8x128xf32>
    %35 = arith.addf %34, %29 : vector<8x128xf32>
    %cst_15 = arith.constant 5.000000e-01 : f32
    %36 = vector.broadcast %cst_15 : f32 to vector<8x128xf32>
    %37 = arith.cmpf ogt, %35, %36 : vector<8x128xf32>
    %38 = arith.extui %37 : vector<8x128xi1> to vector<8x128xi32>
    %39 = arith.sitofp %38 : vector<8x128xi32> to vector<8x128xf32>
    %cst_16 = arith.constant 5.000000e-01 : f32
    %40 = vector.broadcast %cst_16 : f32 to vector<8x128xf32>
    %41 = arith.mulf %29, %40 : vector<8x128xf32>
    %42 = vector.extract_strided_slice %6 {offsets = [2, 0, 0], sizes = [1, 8, 128], strides = [1, 1, 1]} : vector<8x8x128xf32> to vector<1x8x128xf32>
    %43 = vector.shape_cast %42 : vector<1x8x128xf32> to vector<8x128xf32>
    %44 = arith.addf %41, %43 : vector<8x128xf32>
    %cst_17 = arith.constant 7.500000e-01 : f32
    %45 = vector.broadcast %cst_17 : f32 to vector<8x128xf32>
    %46 = arith.mulf %35, %45 : vector<8x128xf32>
    %cst_18 = arith.constant 1.000000e+00 : f32
    %47 = vector.broadcast %cst_18 : f32 to vector<8x128xf32>
    %48 = arith.subf %47, %39 : vector<8x128xf32>
    %49 = arith.mulf %46, %48 : vector<8x128xf32>
    %50 = arith.addf %49, %44 : vector<8x128xf32>
    %cst_19 = arith.constant 5.000000e-01 : f32
    %51 = vector.broadcast %cst_19 : f32 to vector<8x128xf32>
    %52 = arith.cmpf ogt, %50, %51 : vector<8x128xf32>
    %53 = arith.extui %52 : vector<8x128xi1> to vector<8x128xi32>
    %54 = arith.sitofp %53 : vector<8x128xi32> to vector<8x128xf32>
    %cst_20 = arith.constant 5.000000e-01 : f32
    %55 = vector.broadcast %cst_20 : f32 to vector<8x128xf32>
    %56 = arith.mulf %44, %55 : vector<8x128xf32>
    %57 = vector.extract_strided_slice %6 {offsets = [3, 0, 0], sizes = [1, 8, 128], strides = [1, 1, 1]} : vector<8x8x128xf32> to vector<1x8x128xf32>
    %58 = vector.shape_cast %57 : vector<1x8x128xf32> to vector<8x128xf32>
    %59 = arith.addf %56, %58 : vector<8x128xf32>
    %cst_21 = arith.constant 7.500000e-01 : f32
    %60 = vector.broadcast %cst_21 : f32 to vector<8x128xf32>
    %61 = arith.mulf %50, %60 : vector<8x128xf32>
    %cst_22 = arith.constant 1.000000e+00 : f32
    %62 = vector.broadcast %cst_22 : f32 to vector<8x128xf32>
    %63 = arith.subf %62, %54 : vector<8x128xf32>
    %64 = arith.mulf %61, %63 : vector<8x128xf32>
    %65 = arith.addf %64, %59 : vector<8x128xf32>
    %cst_23 = arith.constant 5.000000e-01 : f32
    %66 = vector.broadcast %cst_23 : f32 to vector<8x128xf32>
    %67 = arith.cmpf ogt, %65, %66 : vector<8x128xf32>
    %68 = arith.extui %67 : vector<8x128xi1> to vector<8x128xi32>
    %69 = arith.sitofp %68 : vector<8x128xi32> to vector<8x128xf32>
    %cst_24 = arith.constant 5.000000e-01 : f32
    %70 = vector.broadcast %cst_24 : f32 to vector<8x128xf32>
    %71 = arith.mulf %59, %70 : vector<8x128xf32>
    %72 = vector.extract_strided_slice %6 {offsets = [4, 0, 0], sizes = [1, 8, 128], strides = [1, 1, 1]} : vector<8x8x128xf32> to vector<1x8x128xf32>
    %73 = vector.shape_cast %72 : vector<1x8x128xf32> to vector<8x128xf32>
    %74 = arith.addf %71, %73 : vector<8x128xf32>
    %cst_25 = arith.constant 7.500000e-01 : f32
    %75 = vector.broadcast %cst_25 : f32 to vector<8x128xf32>
    %76 = arith.mulf %65, %75 : vector<8x128xf32>
    %cst_26 = arith.constant 1.000000e+00 : f32
    %77 = vector.broadcast %cst_26 : f32 to vector<8x128xf32>
    %78 = arith.subf %77, %69 : vector<8x128xf32>
    %79 = arith.mulf %76, %78 : vector<8x128xf32>
    %80 = arith.addf %79, %74 : vector<8x128xf32>
    %cst_27 = arith.constant 5.000000e-01 : f32
    %81 = vector.broadcast %cst_27 : f32 to vector<8x128xf32>
    %82 = arith.cmpf ogt, %80, %81 : vector<8x128xf32>
    %83 = arith.extui %82 : vector<8x128xi1> to vector<8x128xi32>
    %84 = arith.sitofp %83 : vector<8x128xi32> to vector<8x128xf32>
    %cst_28 = arith.constant 5.000000e-01 : f32
    %85 = vector.broadcast %cst_28 : f32 to vector<8x128xf32>
    %86 = arith.mulf %74, %85 : vector<8x128xf32>
    %87 = vector.extract_strided_slice %6 {offsets = [5, 0, 0], sizes = [1, 8, 128], strides = [1, 1, 1]} : vector<8x8x128xf32> to vector<1x8x128xf32>
    %88 = vector.shape_cast %87 : vector<1x8x128xf32> to vector<8x128xf32>
    %89 = arith.addf %86, %88 : vector<8x128xf32>
    %cst_29 = arith.constant 7.500000e-01 : f32
    %90 = vector.broadcast %cst_29 : f32 to vector<8x128xf32>
    %91 = arith.mulf %80, %90 : vector<8x128xf32>
    %cst_30 = arith.constant 1.000000e+00 : f32
    %92 = vector.broadcast %cst_30 : f32 to vector<8x128xf32>
    %93 = arith.subf %92, %84 : vector<8x128xf32>
    %94 = arith.mulf %91, %93 : vector<8x128xf32>
    %95 = arith.addf %94, %89 : vector<8x128xf32>
    %cst_31 = arith.constant 5.000000e-01 : f32
    %96 = vector.broadcast %cst_31 : f32 to vector<8x128xf32>
    %97 = arith.cmpf ogt, %95, %96 : vector<8x128xf32>
    %98 = arith.extui %97 : vector<8x128xi1> to vector<8x128xi32>
    %99 = arith.sitofp %98 : vector<8x128xi32> to vector<8x128xf32>
    %cst_32 = arith.constant 5.000000e-01 : f32
    %100 = vector.broadcast %cst_32 : f32 to vector<8x128xf32>
    %101 = arith.mulf %89, %100 : vector<8x128xf32>
    %102 = vector.extract_strided_slice %6 {offsets = [6, 0, 0], sizes = [1, 8, 128], strides = [1, 1, 1]} : vector<8x8x128xf32> to vector<1x8x128xf32>
    %103 = vector.shape_cast %102 : vector<1x8x128xf32> to vector<8x128xf32>
    %104 = arith.addf %101, %103 : vector<8x128xf32>
    %cst_33 = arith.constant 7.500000e-01 : f32
    %105 = vector.broadcast %cst_33 : f32 to vector<8x128xf32>
    %106 = arith.mulf %95, %105 : vector<8x128xf32>
    %cst_34 = arith.constant 1.000000e+00 : f32
    %107 = vector.broadcast %cst_34 : f32 to vector<8x128xf32>
    %108 = arith.subf %107, %99 : vector<8x128xf32>
    %109 = arith.mulf %106, %108 : vector<8x128xf32>
    %110 = arith.addf %109, %104 : vector<8x128xf32>
    %cst_35 = arith.constant 5.000000e-01 : f32
    %111 = vector.broadcast %cst_35 : f32 to vector<8x128xf32>
    %112 = arith.cmpf ogt, %110, %111 : vector<8x128xf32>
    %113 = arith.extui %112 : vector<8x128xi1> to vector<8x128xi32>
    %114 = arith.sitofp %113 : vector<8x128xi32> to vector<8x128xf32>
    %cst_36 = arith.constant 5.000000e-01 : f32
    %115 = vector.broadcast %cst_36 : f32 to vector<8x128xf32>
    %116 = arith.mulf %104, %115 : vector<8x128xf32>
    %117 = vector.extract_strided_slice %6 {offsets = [7, 0, 0], sizes = [1, 8, 128], strides = [1, 1, 1]} : vector<8x8x128xf32> to vector<1x8x128xf32>
    %118 = vector.shape_cast %117 : vector<1x8x128xf32> to vector<8x128xf32>
    %119 = arith.addf %116, %118 : vector<8x128xf32>
    %cst_37 = arith.constant 7.500000e-01 : f32
    %120 = vector.broadcast %cst_37 : f32 to vector<8x128xf32>
    %121 = arith.mulf %110, %120 : vector<8x128xf32>
    %cst_38 = arith.constant 1.000000e+00 : f32
    %122 = vector.broadcast %cst_38 : f32 to vector<8x128xf32>
    %123 = arith.subf %122, %114 : vector<8x128xf32>
    %124 = arith.mulf %121, %123 : vector<8x128xf32>
    %125 = arith.addf %124, %119 : vector<8x128xf32>
    %cst_39 = arith.constant 5.000000e-01 : f32
    %126 = vector.broadcast %cst_39 : f32 to vector<8x128xf32>
    %127 = arith.cmpf ogt, %125, %126 : vector<8x128xf32>
    %128 = arith.extui %127 : vector<8x128xi1> to vector<8x128xi32>
    %129 = arith.sitofp %128 : vector<8x128xi32> to vector<8x128xf32>
    %130 = tpu.concatenate %24, %39, %54, %69, %84, %99, %114, %129 in 0 : vector<8x128xf32>, vector<8x128xf32>, vector<8x128xf32>, vector<8x128xf32>, vector<8x128xf32>, vector<8x128xf32>, vector<8x128xf32>, vector<8x128xf32> -> vector<64x128xf32>
    %c0_40 = arith.constant 0 : index
    %c0_41 = arith.constant 0 : index
    %131 = vector.load %arg3[%c0_40, %c0_41] : memref<128x128xf32, #tpu.memory_space<vmem>>, vector<128x128xf32>
    %cst_42 = arith.constant dense<0.000000e+00> : vector<64x128xf32>
    %132 = tpu.matmul %130, %131, %cst_42 {dimension_numbers = #tpu.dot_dimension_numbers<[1], [0], [0], [1], [0, 0, 1, 1], [], []>} : vector<64x128xf32>, vector<128x128xf32>, vector<64x128xf32> -> vector<64x128xf32>
    %c0_43 = arith.constant 0 : index
    %c0_44 = arith.constant 0 : index
    %133 = vector.load %arg4[%c0_43, %c0_44] : memref<1x128xf32, #tpu.memory_space<vmem>>, vector<1x128xf32>
    %134 = vector.broadcast %133 : vector<1x128xf32> to vector<64x128xf32>
    %135 = arith.addf %132, %134 : vector<64x128xf32>
    %136 = vector.shape_cast %135 : vector<64x128xf32> to vector<8x8x128xf32>
    %cst_45 = arith.constant 0.000000e+00 : f32
    %137 = vector.broadcast %cst_45 : f32 to vector<8x128xf32>
    %cst_46 = arith.constant 0.000000e+00 : f32
    %138 = vector.broadcast %cst_46 : f32 to vector<8x128xf32>
    %cst_47 = arith.constant 0.000000e+00 : f32
    %139 = vector.broadcast %cst_47 : f32 to vector<8x128xf32>
    %cst_48 = arith.constant 5.000000e-01 : f32
    %140 = vector.broadcast %cst_48 : f32 to vector<8x128xf32>
    %141 = arith.mulf %137, %140 : vector<8x128xf32>
    %142 = vector.extract_strided_slice %136 {offsets = [0, 0, 0], sizes = [1, 8, 128], strides = [1, 1, 1]} : vector<8x8x128xf32> to vector<1x8x128xf32>
    %143 = vector.shape_cast %142 : vector<1x8x128xf32> to vector<8x128xf32>
    %144 = arith.addf %141, %143 : vector<8x128xf32>
    %cst_49 = arith.constant 7.500000e-01 : f32
    %145 = vector.broadcast %cst_49 : f32 to vector<8x128xf32>
    %146 = arith.mulf %138, %145 : vector<8x128xf32>
    %cst_50 = arith.constant 1.000000e+00 : f32
    %147 = vector.broadcast %cst_50 : f32 to vector<8x128xf32>
    %148 = arith.subf %147, %139 : vector<8x128xf32>
    %149 = arith.mulf %146, %148 : vector<8x128xf32>
    %150 = arith.addf %149, %144 : vector<8x128xf32>
    %cst_51 = arith.constant 5.000000e-01 : f32
    %151 = vector.broadcast %cst_51 : f32 to vector<8x128xf32>
    %152 = arith.cmpf ogt, %150, %151 : vector<8x128xf32>
    %153 = arith.extui %152 : vector<8x128xi1> to vector<8x128xi32>
    %154 = arith.sitofp %153 : vector<8x128xi32> to vector<8x128xf32>
    %cst_52 = arith.constant 5.000000e-01 : f32
    %155 = vector.broadcast %cst_52 : f32 to vector<8x128xf32>
    %156 = arith.mulf %144, %155 : vector<8x128xf32>
    %157 = vector.extract_strided_slice %136 {offsets = [1, 0, 0], sizes = [1, 8, 128], strides = [1, 1, 1]} : vector<8x8x128xf32> to vector<1x8x128xf32>
    %158 = vector.shape_cast %157 : vector<1x8x128xf32> to vector<8x128xf32>
    %159 = arith.addf %156, %158 : vector<8x128xf32>
    %cst_53 = arith.constant 7.500000e-01 : f32
    %160 = vector.broadcast %cst_53 : f32 to vector<8x128xf32>
    %161 = arith.mulf %150, %160 : vector<8x128xf32>
    %cst_54 = arith.constant 1.000000e+00 : f32
    %162 = vector.broadcast %cst_54 : f32 to vector<8x128xf32>
    %163 = arith.subf %162, %154 : vector<8x128xf32>
    %164 = arith.mulf %161, %163 : vector<8x128xf32>
    %165 = arith.addf %164, %159 : vector<8x128xf32>
    %cst_55 = arith.constant 5.000000e-01 : f32
    %166 = vector.broadcast %cst_55 : f32 to vector<8x128xf32>
    %167 = arith.cmpf ogt, %165, %166 : vector<8x128xf32>
    %168 = arith.extui %167 : vector<8x128xi1> to vector<8x128xi32>
    %169 = arith.sitofp %168 : vector<8x128xi32> to vector<8x128xf32>
    %cst_56 = arith.constant 5.000000e-01 : f32
    %170 = vector.broadcast %cst_56 : f32 to vector<8x128xf32>
    %171 = arith.mulf %159, %170 : vector<8x128xf32>
    %172 = vector.extract_strided_slice %136 {offsets = [2, 0, 0], sizes = [1, 8, 128], strides = [1, 1, 1]} : vector<8x8x128xf32> to vector<1x8x128xf32>
    %173 = vector.shape_cast %172 : vector<1x8x128xf32> to vector<8x128xf32>
    %174 = arith.addf %171, %173 : vector<8x128xf32>
    %cst_57 = arith.constant 7.500000e-01 : f32
    %175 = vector.broadcast %cst_57 : f32 to vector<8x128xf32>
    %176 = arith.mulf %165, %175 : vector<8x128xf32>
    %cst_58 = arith.constant 1.000000e+00 : f32
    %177 = vector.broadcast %cst_58 : f32 to vector<8x128xf32>
    %178 = arith.subf %177, %169 : vector<8x128xf32>
    %179 = arith.mulf %176, %178 : vector<8x128xf32>
    %180 = arith.addf %179, %174 : vector<8x128xf32>
    %cst_59 = arith.constant 5.000000e-01 : f32
    %181 = vector.broadcast %cst_59 : f32 to vector<8x128xf32>
    %182 = arith.cmpf ogt, %180, %181 : vector<8x128xf32>
    %183 = arith.extui %182 : vector<8x128xi1> to vector<8x128xi32>
    %184 = arith.sitofp %183 : vector<8x128xi32> to vector<8x128xf32>
    %cst_60 = arith.constant 5.000000e-01 : f32
    %185 = vector.broadcast %cst_60 : f32 to vector<8x128xf32>
    %186 = arith.mulf %174, %185 : vector<8x128xf32>
    %187 = vector.extract_strided_slice %136 {offsets = [3, 0, 0], sizes = [1, 8, 128], strides = [1, 1, 1]} : vector<8x8x128xf32> to vector<1x8x128xf32>
    %188 = vector.shape_cast %187 : vector<1x8x128xf32> to vector<8x128xf32>
    %189 = arith.addf %186, %188 : vector<8x128xf32>
    %cst_61 = arith.constant 7.500000e-01 : f32
    %190 = vector.broadcast %cst_61 : f32 to vector<8x128xf32>
    %191 = arith.mulf %180, %190 : vector<8x128xf32>
    %cst_62 = arith.constant 1.000000e+00 : f32
    %192 = vector.broadcast %cst_62 : f32 to vector<8x128xf32>
    %193 = arith.subf %192, %184 : vector<8x128xf32>
    %194 = arith.mulf %191, %193 : vector<8x128xf32>
    %195 = arith.addf %194, %189 : vector<8x128xf32>
    %cst_63 = arith.constant 5.000000e-01 : f32
    %196 = vector.broadcast %cst_63 : f32 to vector<8x128xf32>
    %197 = arith.cmpf ogt, %195, %196 : vector<8x128xf32>
    %198 = arith.extui %197 : vector<8x128xi1> to vector<8x128xi32>
    %199 = arith.sitofp %198 : vector<8x128xi32> to vector<8x128xf32>
    %cst_64 = arith.constant 5.000000e-01 : f32
    %200 = vector.broadcast %cst_64 : f32 to vector<8x128xf32>
    %201 = arith.mulf %189, %200 : vector<8x128xf32>
    %202 = vector.extract_strided_slice %136 {offsets = [4, 0, 0], sizes = [1, 8, 128], strides = [1, 1, 1]} : vector<8x8x128xf32> to vector<1x8x128xf32>
    %203 = vector.shape_cast %202 : vector<1x8x128xf32> to vector<8x128xf32>
    %204 = arith.addf %201, %203 : vector<8x128xf32>
    %cst_65 = arith.constant 7.500000e-01 : f32
    %205 = vector.broadcast %cst_65 : f32 to vector<8x128xf32>
    %206 = arith.mulf %195, %205 : vector<8x128xf32>
    %cst_66 = arith.constant 1.000000e+00 : f32
    %207 = vector.broadcast %cst_66 : f32 to vector<8x128xf32>
    %208 = arith.subf %207, %199 : vector<8x128xf32>
    %209 = arith.mulf %206, %208 : vector<8x128xf32>
    %210 = arith.addf %209, %204 : vector<8x128xf32>
    %cst_67 = arith.constant 5.000000e-01 : f32
    %211 = vector.broadcast %cst_67 : f32 to vector<8x128xf32>
    %212 = arith.cmpf ogt, %210, %211 : vector<8x128xf32>
    %213 = arith.extui %212 : vector<8x128xi1> to vector<8x128xi32>
    %214 = arith.sitofp %213 : vector<8x128xi32> to vector<8x128xf32>
    %cst_68 = arith.constant 5.000000e-01 : f32
    %215 = vector.broadcast %cst_68 : f32 to vector<8x128xf32>
    %216 = arith.mulf %204, %215 : vector<8x128xf32>
    %217 = vector.extract_strided_slice %136 {offsets = [5, 0, 0], sizes = [1, 8, 128], strides = [1, 1, 1]} : vector<8x8x128xf32> to vector<1x8x128xf32>
    %218 = vector.shape_cast %217 : vector<1x8x128xf32> to vector<8x128xf32>
    %219 = arith.addf %216, %218 : vector<8x128xf32>
    %cst_69 = arith.constant 7.500000e-01 : f32
    %220 = vector.broadcast %cst_69 : f32 to vector<8x128xf32>
    %221 = arith.mulf %210, %220 : vector<8x128xf32>
    %cst_70 = arith.constant 1.000000e+00 : f32
    %222 = vector.broadcast %cst_70 : f32 to vector<8x128xf32>
    %223 = arith.subf %222, %214 : vector<8x128xf32>
    %224 = arith.mulf %221, %223 : vector<8x128xf32>
    %225 = arith.addf %224, %219 : vector<8x128xf32>
    %cst_71 = arith.constant 5.000000e-01 : f32
    %226 = vector.broadcast %cst_71 : f32 to vector<8x128xf32>
    %227 = arith.cmpf ogt, %225, %226 : vector<8x128xf32>
    %228 = arith.extui %227 : vector<8x128xi1> to vector<8x128xi32>
    %229 = arith.sitofp %228 : vector<8x128xi32> to vector<8x128xf32>
    %cst_72 = arith.constant 5.000000e-01 : f32
    %230 = vector.broadcast %cst_72 : f32 to vector<8x128xf32>
    %231 = arith.mulf %219, %230 : vector<8x128xf32>
    %232 = vector.extract_strided_slice %136 {offsets = [6, 0, 0], sizes = [1, 8, 128], strides = [1, 1, 1]} : vector<8x8x128xf32> to vector<1x8x128xf32>
    %233 = vector.shape_cast %232 : vector<1x8x128xf32> to vector<8x128xf32>
    %234 = arith.addf %231, %233 : vector<8x128xf32>
    %cst_73 = arith.constant 7.500000e-01 : f32
    %235 = vector.broadcast %cst_73 : f32 to vector<8x128xf32>
    %236 = arith.mulf %225, %235 : vector<8x128xf32>
    %cst_74 = arith.constant 1.000000e+00 : f32
    %237 = vector.broadcast %cst_74 : f32 to vector<8x128xf32>
    %238 = arith.subf %237, %229 : vector<8x128xf32>
    %239 = arith.mulf %236, %238 : vector<8x128xf32>
    %240 = arith.addf %239, %234 : vector<8x128xf32>
    %cst_75 = arith.constant 5.000000e-01 : f32
    %241 = vector.broadcast %cst_75 : f32 to vector<8x128xf32>
    %242 = arith.cmpf ogt, %240, %241 : vector<8x128xf32>
    %243 = arith.extui %242 : vector<8x128xi1> to vector<8x128xi32>
    %244 = arith.sitofp %243 : vector<8x128xi32> to vector<8x128xf32>
    %cst_76 = arith.constant 5.000000e-01 : f32
    %245 = vector.broadcast %cst_76 : f32 to vector<8x128xf32>
    %246 = arith.mulf %234, %245 : vector<8x128xf32>
    %247 = vector.extract_strided_slice %136 {offsets = [7, 0, 0], sizes = [1, 8, 128], strides = [1, 1, 1]} : vector<8x8x128xf32> to vector<1x8x128xf32>
    %248 = vector.shape_cast %247 : vector<1x8x128xf32> to vector<8x128xf32>
    %249 = arith.addf %246, %248 : vector<8x128xf32>
    %cst_77 = arith.constant 7.500000e-01 : f32
    %250 = vector.broadcast %cst_77 : f32 to vector<8x128xf32>
    %251 = arith.mulf %240, %250 : vector<8x128xf32>
    %cst_78 = arith.constant 1.000000e+00 : f32
    %252 = vector.broadcast %cst_78 : f32 to vector<8x128xf32>
    %253 = arith.subf %252, %244 : vector<8x128xf32>
    %254 = arith.mulf %251, %253 : vector<8x128xf32>
    %255 = arith.addf %254, %249 : vector<8x128xf32>
    %cst_79 = arith.constant 5.000000e-01 : f32
    %256 = vector.broadcast %cst_79 : f32 to vector<8x128xf32>
    %257 = arith.cmpf ogt, %255, %256 : vector<8x128xf32>
    %258 = arith.extui %257 : vector<8x128xi1> to vector<8x128xi32>
    %259 = arith.sitofp %258 : vector<8x128xi32> to vector<8x128xf32>
    %260 = tpu.concatenate %154, %169, %184, %199, %214, %229, %244, %259 in 0 : vector<8x128xf32>, vector<8x128xf32>, vector<8x128xf32>, vector<8x128xf32>, vector<8x128xf32>, vector<8x128xf32>, vector<8x128xf32>, vector<8x128xf32> -> vector<64x128xf32>
    %c0_80 = arith.constant 0 : index
    %c0_81 = arith.constant 0 : index
    %261 = vector.load %arg5[%c0_80, %c0_81] : memref<128x128xf32, #tpu.memory_space<vmem>>, vector<128x128xf32>
    %cst_82 = arith.constant dense<0.000000e+00> : vector<64x128xf32>
    %262 = tpu.matmul %260, %261, %cst_82 {dimension_numbers = #tpu.dot_dimension_numbers<[1], [0], [0], [1], [0, 0, 1, 1], [], []>} : vector<64x128xf32>, vector<128x128xf32>, vector<64x128xf32> -> vector<64x128xf32>
    %c0_83 = arith.constant 0 : index
    %c0_84 = arith.constant 0 : index
    %263 = vector.load %arg6[%c0_83, %c0_84] : memref<1x128xf32, #tpu.memory_space<vmem>>, vector<1x128xf32>
    %264 = vector.broadcast %263 : vector<1x128xf32> to vector<64x128xf32>
    %265 = arith.addf %262, %264 : vector<64x128xf32>
    %266 = vector.shape_cast %265 : vector<64x128xf32> to vector<8x8x128xf32>
    %cst_85 = arith.constant 0.000000e+00 : f32
    %267 = vector.broadcast %cst_85 : f32 to vector<8x128xf32>
    %cst_86 = arith.constant 0.000000e+00 : f32
    %268 = vector.broadcast %cst_86 : f32 to vector<8x128xf32>
    %cst_87 = arith.constant 0.000000e+00 : f32
    %269 = vector.broadcast %cst_87 : f32 to vector<8x128xf32>
    %cst_88 = arith.constant 0.000000e+00 : f32
    %270 = vector.broadcast %cst_88 : f32 to vector<8x128xf32>
    %cst_89 = arith.constant 5.000000e-01 : f32
    %271 = vector.broadcast %cst_89 : f32 to vector<8x128xf32>
    %272 = arith.mulf %267, %271 : vector<8x128xf32>
    %273 = vector.extract_strided_slice %266 {offsets = [0, 0, 0], sizes = [1, 8, 128], strides = [1, 1, 1]} : vector<8x8x128xf32> to vector<1x8x128xf32>
    %274 = vector.shape_cast %273 : vector<1x8x128xf32> to vector<8x128xf32>
    %275 = arith.addf %272, %274 : vector<8x128xf32>
    %cst_90 = arith.constant 7.500000e-01 : f32
    %276 = vector.broadcast %cst_90 : f32 to vector<8x128xf32>
    %277 = arith.mulf %268, %276 : vector<8x128xf32>
    %cst_91 = arith.constant 1.000000e+00 : f32
    %278 = vector.broadcast %cst_91 : f32 to vector<8x128xf32>
    %279 = arith.subf %278, %269 : vector<8x128xf32>
    %280 = arith.mulf %277, %279 : vector<8x128xf32>
    %281 = arith.addf %280, %275 : vector<8x128xf32>
    %cst_92 = arith.constant 5.000000e-01 : f32
    %282 = vector.broadcast %cst_92 : f32 to vector<8x128xf32>
    %283 = arith.cmpf ogt, %281, %282 : vector<8x128xf32>
    %284 = arith.extui %283 : vector<8x128xi1> to vector<8x128xi32>
    %285 = arith.sitofp %284 : vector<8x128xi32> to vector<8x128xf32>
    %286 = arith.addf %270, %285 : vector<8x128xf32>
    %cst_93 = arith.constant 5.000000e-01 : f32
    %287 = vector.broadcast %cst_93 : f32 to vector<8x128xf32>
    %288 = arith.mulf %275, %287 : vector<8x128xf32>
    %289 = vector.extract_strided_slice %266 {offsets = [1, 0, 0], sizes = [1, 8, 128], strides = [1, 1, 1]} : vector<8x8x128xf32> to vector<1x8x128xf32>
    %290 = vector.shape_cast %289 : vector<1x8x128xf32> to vector<8x128xf32>
    %291 = arith.addf %288, %290 : vector<8x128xf32>
    %cst_94 = arith.constant 7.500000e-01 : f32
    %292 = vector.broadcast %cst_94 : f32 to vector<8x128xf32>
    %293 = arith.mulf %281, %292 : vector<8x128xf32>
    %cst_95 = arith.constant 1.000000e+00 : f32
    %294 = vector.broadcast %cst_95 : f32 to vector<8x128xf32>
    %295 = arith.subf %294, %285 : vector<8x128xf32>
    %296 = arith.mulf %293, %295 : vector<8x128xf32>
    %297 = arith.addf %296, %291 : vector<8x128xf32>
    %cst_96 = arith.constant 5.000000e-01 : f32
    %298 = vector.broadcast %cst_96 : f32 to vector<8x128xf32>
    %299 = arith.cmpf ogt, %297, %298 : vector<8x128xf32>
    %300 = arith.extui %299 : vector<8x128xi1> to vector<8x128xi32>
    %301 = arith.sitofp %300 : vector<8x128xi32> to vector<8x128xf32>
    %302 = arith.addf %286, %301 : vector<8x128xf32>
    %cst_97 = arith.constant 5.000000e-01 : f32
    %303 = vector.broadcast %cst_97 : f32 to vector<8x128xf32>
    %304 = arith.mulf %291, %303 : vector<8x128xf32>
    %305 = vector.extract_strided_slice %266 {offsets = [2, 0, 0], sizes = [1, 8, 128], strides = [1, 1, 1]} : vector<8x8x128xf32> to vector<1x8x128xf32>
    %306 = vector.shape_cast %305 : vector<1x8x128xf32> to vector<8x128xf32>
    %307 = arith.addf %304, %306 : vector<8x128xf32>
    %cst_98 = arith.constant 7.500000e-01 : f32
    %308 = vector.broadcast %cst_98 : f32 to vector<8x128xf32>
    %309 = arith.mulf %297, %308 : vector<8x128xf32>
    %cst_99 = arith.constant 1.000000e+00 : f32
    %310 = vector.broadcast %cst_99 : f32 to vector<8x128xf32>
    %311 = arith.subf %310, %301 : vector<8x128xf32>
    %312 = arith.mulf %309, %311 : vector<8x128xf32>
    %313 = arith.addf %312, %307 : vector<8x128xf32>
    %cst_100 = arith.constant 5.000000e-01 : f32
    %314 = vector.broadcast %cst_100 : f32 to vector<8x128xf32>
    %315 = arith.cmpf ogt, %313, %314 : vector<8x128xf32>
    %316 = arith.extui %315 : vector<8x128xi1> to vector<8x128xi32>
    %317 = arith.sitofp %316 : vector<8x128xi32> to vector<8x128xf32>
    %318 = arith.addf %302, %317 : vector<8x128xf32>
    %cst_101 = arith.constant 5.000000e-01 : f32
    %319 = vector.broadcast %cst_101 : f32 to vector<8x128xf32>
    %320 = arith.mulf %307, %319 : vector<8x128xf32>
    %321 = vector.extract_strided_slice %266 {offsets = [3, 0, 0], sizes = [1, 8, 128], strides = [1, 1, 1]} : vector<8x8x128xf32> to vector<1x8x128xf32>
    %322 = vector.shape_cast %321 : vector<1x8x128xf32> to vector<8x128xf32>
    %323 = arith.addf %320, %322 : vector<8x128xf32>
    %cst_102 = arith.constant 7.500000e-01 : f32
    %324 = vector.broadcast %cst_102 : f32 to vector<8x128xf32>
    %325 = arith.mulf %313, %324 : vector<8x128xf32>
    %cst_103 = arith.constant 1.000000e+00 : f32
    %326 = vector.broadcast %cst_103 : f32 to vector<8x128xf32>
    %327 = arith.subf %326, %317 : vector<8x128xf32>
    %328 = arith.mulf %325, %327 : vector<8x128xf32>
    %329 = arith.addf %328, %323 : vector<8x128xf32>
    %cst_104 = arith.constant 5.000000e-01 : f32
    %330 = vector.broadcast %cst_104 : f32 to vector<8x128xf32>
    %331 = arith.cmpf ogt, %329, %330 : vector<8x128xf32>
    %332 = arith.extui %331 : vector<8x128xi1> to vector<8x128xi32>
    %333 = arith.sitofp %332 : vector<8x128xi32> to vector<8x128xf32>
    %334 = arith.addf %318, %333 : vector<8x128xf32>
    %cst_105 = arith.constant 5.000000e-01 : f32
    %335 = vector.broadcast %cst_105 : f32 to vector<8x128xf32>
    %336 = arith.mulf %323, %335 : vector<8x128xf32>
    %337 = vector.extract_strided_slice %266 {offsets = [4, 0, 0], sizes = [1, 8, 128], strides = [1, 1, 1]} : vector<8x8x128xf32> to vector<1x8x128xf32>
    %338 = vector.shape_cast %337 : vector<1x8x128xf32> to vector<8x128xf32>
    %339 = arith.addf %336, %338 : vector<8x128xf32>
    %cst_106 = arith.constant 7.500000e-01 : f32
    %340 = vector.broadcast %cst_106 : f32 to vector<8x128xf32>
    %341 = arith.mulf %329, %340 : vector<8x128xf32>
    %cst_107 = arith.constant 1.000000e+00 : f32
    %342 = vector.broadcast %cst_107 : f32 to vector<8x128xf32>
    %343 = arith.subf %342, %333 : vector<8x128xf32>
    %344 = arith.mulf %341, %343 : vector<8x128xf32>
    %345 = arith.addf %344, %339 : vector<8x128xf32>
    %cst_108 = arith.constant 5.000000e-01 : f32
    %346 = vector.broadcast %cst_108 : f32 to vector<8x128xf32>
    %347 = arith.cmpf ogt, %345, %346 : vector<8x128xf32>
    %348 = arith.extui %347 : vector<8x128xi1> to vector<8x128xi32>
    %349 = arith.sitofp %348 : vector<8x128xi32> to vector<8x128xf32>
    %350 = arith.addf %334, %349 : vector<8x128xf32>
    %cst_109 = arith.constant 5.000000e-01 : f32
    %351 = vector.broadcast %cst_109 : f32 to vector<8x128xf32>
    %352 = arith.mulf %339, %351 : vector<8x128xf32>
    %353 = vector.extract_strided_slice %266 {offsets = [5, 0, 0], sizes = [1, 8, 128], strides = [1, 1, 1]} : vector<8x8x128xf32> to vector<1x8x128xf32>
    %354 = vector.shape_cast %353 : vector<1x8x128xf32> to vector<8x128xf32>
    %355 = arith.addf %352, %354 : vector<8x128xf32>
    %cst_110 = arith.constant 7.500000e-01 : f32
    %356 = vector.broadcast %cst_110 : f32 to vector<8x128xf32>
    %357 = arith.mulf %345, %356 : vector<8x128xf32>
    %cst_111 = arith.constant 1.000000e+00 : f32
    %358 = vector.broadcast %cst_111 : f32 to vector<8x128xf32>
    %359 = arith.subf %358, %349 : vector<8x128xf32>
    %360 = arith.mulf %357, %359 : vector<8x128xf32>
    %361 = arith.addf %360, %355 : vector<8x128xf32>
    %cst_112 = arith.constant 5.000000e-01 : f32
    %362 = vector.broadcast %cst_112 : f32 to vector<8x128xf32>
    %363 = arith.cmpf ogt, %361, %362 : vector<8x128xf32>
    %364 = arith.extui %363 : vector<8x128xi1> to vector<8x128xi32>
    %365 = arith.sitofp %364 : vector<8x128xi32> to vector<8x128xf32>
    %366 = arith.addf %350, %365 : vector<8x128xf32>
    %cst_113 = arith.constant 5.000000e-01 : f32
    %367 = vector.broadcast %cst_113 : f32 to vector<8x128xf32>
    %368 = arith.mulf %355, %367 : vector<8x128xf32>
    %369 = vector.extract_strided_slice %266 {offsets = [6, 0, 0], sizes = [1, 8, 128], strides = [1, 1, 1]} : vector<8x8x128xf32> to vector<1x8x128xf32>
    %370 = vector.shape_cast %369 : vector<1x8x128xf32> to vector<8x128xf32>
    %371 = arith.addf %368, %370 : vector<8x128xf32>
    %cst_114 = arith.constant 7.500000e-01 : f32
    %372 = vector.broadcast %cst_114 : f32 to vector<8x128xf32>
    %373 = arith.mulf %361, %372 : vector<8x128xf32>
    %cst_115 = arith.constant 1.000000e+00 : f32
    %374 = vector.broadcast %cst_115 : f32 to vector<8x128xf32>
    %375 = arith.subf %374, %365 : vector<8x128xf32>
    %376 = arith.mulf %373, %375 : vector<8x128xf32>
    %377 = arith.addf %376, %371 : vector<8x128xf32>
    %cst_116 = arith.constant 5.000000e-01 : f32
    %378 = vector.broadcast %cst_116 : f32 to vector<8x128xf32>
    %379 = arith.cmpf ogt, %377, %378 : vector<8x128xf32>
    %380 = arith.extui %379 : vector<8x128xi1> to vector<8x128xi32>
    %381 = arith.sitofp %380 : vector<8x128xi32> to vector<8x128xf32>
    %382 = arith.addf %366, %381 : vector<8x128xf32>
    %cst_117 = arith.constant 5.000000e-01 : f32
    %383 = vector.broadcast %cst_117 : f32 to vector<8x128xf32>
    %384 = arith.mulf %371, %383 : vector<8x128xf32>
    %385 = vector.extract_strided_slice %266 {offsets = [7, 0, 0], sizes = [1, 8, 128], strides = [1, 1, 1]} : vector<8x8x128xf32> to vector<1x8x128xf32>
    %386 = vector.shape_cast %385 : vector<1x8x128xf32> to vector<8x128xf32>
    %387 = arith.addf %384, %386 : vector<8x128xf32>
    %cst_118 = arith.constant 7.500000e-01 : f32
    %388 = vector.broadcast %cst_118 : f32 to vector<8x128xf32>
    %389 = arith.mulf %377, %388 : vector<8x128xf32>
    %cst_119 = arith.constant 1.000000e+00 : f32
    %390 = vector.broadcast %cst_119 : f32 to vector<8x128xf32>
    %391 = arith.subf %390, %381 : vector<8x128xf32>
    %392 = arith.mulf %389, %391 : vector<8x128xf32>
    %393 = arith.addf %392, %387 : vector<8x128xf32>
    %cst_120 = arith.constant 5.000000e-01 : f32
    %394 = vector.broadcast %cst_120 : f32 to vector<8x128xf32>
    %395 = arith.cmpf ogt, %393, %394 : vector<8x128xf32>
    %396 = arith.extui %395 : vector<8x128xi1> to vector<8x128xi32>
    %397 = arith.sitofp %396 : vector<8x128xi32> to vector<8x128xf32>
    %398 = arith.addf %382, %397 : vector<8x128xf32>
    %cst_121 = arith.constant 1.250000e-01 : f32
    %399 = vector.broadcast %cst_121 : f32 to vector<8x128xf32>
    %400 = arith.mulf %398, %399 : vector<8x128xf32>
    %c0_122 = arith.constant 0 : index
    %c0_123 = arith.constant 0 : index
    %401 = vector.load %arg7[%c0_122, %c0_123] : memref<8x128xf32, #tpu.memory_space<vmem>>, vector<8x128xf32>
    tpu.vector_store %arg7[%c0_122, %c0_123], %400 {strides = array<i32>} : memref<8x128xf32, #tpu.memory_space<vmem>>, vector<8x128xf32>,
    return
  }
}

</mosaic_0001>

<bundles_post_ra>
// kernel: tpu_custom_call.1
= control target key start
LH: loop header
LB: loop body
LE: loop exit
PB: predicated region body
PF: predicated region fallthrough
CT: control target
= control target key end

     0   :  { %12 = vsyncpa [#allocation3], 0  ;;  %s1411_s0 = inlined_call_operand.hbm [shape: f32[64,128], index: 0, kind: input, shape index: {}]   ;;  %s1412_s1 = inlined_call_operand.hbm [shape: f32[128,128], index: 1, kind: input, shape index: {}]   ;;  %s1413_s2 = inlined_call_operand.vmem [shape: f32[1,128], index: 2, kind: input, shape index: {}]   ;;  %s1414_s3 = inlined_call_operand.hbm [shape: f32[128,128], index: 3, kind: input, shape index: {}]   ;;  %s1415_s4 = inlined_call_operand.vmem [shape: f32[1,128], index: 4, kind: input, shape index: {}]   ;;  %s1416_s5 = inlined_call_operand.hbm [shape: f32[128,128], index: 5, kind: input, shape index: {}]   ;;  %s1417_s6 = inlined_call_operand.vmem [shape: f32[1,128], index: 6, kind: input, shape index: {}]   ;;  %s1418_s7 = inlined_call_operand.hbm [shape: f32[8,128], index: 7, kind: output, shape index: {}]  }
   0x1   :  { %13 = vsyncpa [#allocation6], 0 }
   0x2   :  { %14 = vsyncpa [#allocation9], 0 }
   0x3   :  { %15 = vsyncpa [#allocation4], 0  ;;  %s1191_s24 = smov [#allocation5]   ;;  %s1192_s26 = smov [#allocation2]  }
   0x4   :  { %s33_s25 = sshll.u32 %s1191_s24, 4  ;;  %s21_s27 = sshll.u32 %s1192_s26, 4  ;;  %s34_s25 = int_to_ptr.vmem [resolvable:$true] %s33_s25  ;;  %s1240_s27 = int_to_ptr.vmem [resolvable:$true] %s21_s27 }
   0x5   :  { %s1073_s30 = scalar_lea.hbm %s1412_s1, 2048 }
   0x6   :  { %p1074_p0 = scmp.ne.s32.totalorder %s1412_s1, %s1073_s30  ;;  %p1077_p1 = scmp.lt.u32.totalorder %s1073_s30, %s1412_s1 }
   0x8   :  { %p1079_p2 = pnand %p1077_p1, %p1074_p0 }
   0xa   :  { %1082 = shalt.err (!%p1079_p2)
}
   0xb   :  { %s1083_s12 = scalar_lea.vmem %s34_s25, 2048  ;;  %p1088_p4 = scmp.lt.s32.totalorder %s34_s25, %s34_s25 }
   0xc   :  { %p1084_p3 = scmp.ne.s32.totalorder %s34_s25, %s1083_s12  ;;  %p1089_p5 = scmp.lt.s32.totalorder %s1083_s12, %s1083_s12 }
   0xe   :  { %p1090_p6 = por %p1089_p5, %p1088_p4 }
  0x10   :  { %p1091_p7 = pnand %p1090_p6, %p1084_p3 }
  0x12   :  { %1094 = shalt.err (!%p1091_p7)
}
  0x13   :  { %s1193_s13 = smov 128   ;;  %s1194_s14 = smov 8  }
  0x14   :  { %39 = dma.hbm_to_vmem [thread:$0]  %s1412_s1, 2048, %s34_s25, [#allocation6], %s1193_s13, %s1193_s13, %s1194_s14  }
  0x15   :  { %s1095_s19 = scalar_lea.hbm %s1411_s0, 1024 }
  0x16   :  { %p1096_p8 = scmp.ne.s32.totalorder %s1411_s0, %s1095_s19  ;;  %p1099_p9 = scmp.lt.u32.totalorder %s1095_s19, %s1411_s0 }
  0x18   :  { %p1101_p10 = pnand %p1099_p9, %p1096_p8 }
  0x1a   :  { %1104 = shalt.err (!%p1101_p10)
}
  0x1b   :  { %s1105_s24 = scalar_lea.vmem %s1240_s27, 1024  ;;  %p1110_p12 = scmp.lt.s32.totalorder %s1240_s27, %s1240_s27 }
  0x1c   :  { %p1106_p11 = scmp.ne.s32.totalorder %s1240_s27, %s1105_s24  ;;  %p1111_p13 = scmp.lt.s32.totalorder %s1105_s24, %s1105_s24 }
  0x1e   :  { %p1112_p0 = por %p1111_p13, %p1110_p12 }
  0x20   :  { %p1113_p1 = pnand %p1112_p0, %p1106_p11 }
  0x22   :  { %1116 = shalt.err (!%p1113_p1)
}
  0x23   :  { %27 = dma.hbm_to_vmem [thread:$0]  %s1411_s0, 1024, %s1240_s27, [#allocation3], %s1193_s13, %s1193_s13, %s1194_s14  }
  0x24   :  { %s1195_s26 = smov [#allocation7]   ;;  %s1196_s29 = smov [#allocation8]  }
  0x25   :  { %s47_s28 = sshll.u32 %s1195_s26, 4  ;;  %s61_s30 = sshll.u32 %s1196_s29, 4  ;;  %s48_s28 = int_to_ptr.vmem [resolvable:$true] %s47_s28  ;;  %s1277_s30 = int_to_ptr.vmem [resolvable:$true] %s61_s30 }
  0x26   :  { %s1117_s10 = scalar_lea.hbm %s1414_s3, 2048 }
  0x27   :  { %p1118_p2 = scmp.ne.s32.totalorder %s1414_s3, %s1117_s10  ;;  %p1121_p3 = scmp.lt.u32.totalorder %s1117_s10, %s1414_s3 }
  0x29   :  { %p1123_p4 = pnand %p1121_p3, %p1118_p2 }
  0x2b   :  { %1126 = shalt.err (!%p1123_p4)
}
  0x2c   :  { %s1127_s0 = scalar_lea.vmem %s48_s28, 2048  ;;  %p1132_p6 = scmp.lt.s32.totalorder %s48_s28, %s48_s28 }
  0x2d   :  { %p1128_p5 = scmp.ne.s32.totalorder %s48_s28, %s1127_s0  ;;  %p1133_p7 = scmp.lt.s32.totalorder %s1127_s0, %s1127_s0 }
  0x2f   :  { %p1134_p8 = por %p1133_p7, %p1132_p6 }
  0x31   :  { %p1135_p9 = pnand %p1134_p8, %p1128_p5 }
  0x33   :  { %1138 = shalt.err (!%p1135_p9)
}
  0x34   :  { %53 = dma.hbm_to_vmem [thread:$0]  %s1414_s3, 2048, %s48_s28, [#allocation6], %s1193_s13, %s1193_s13, %s1194_s14  }
  0x35   :  { %s1139_s20 = scalar_lea.hbm %s1416_s5, 2048 }
  0x36   :  { %p1140_p10 = scmp.ne.s32.totalorder %s1416_s5, %s1139_s20  ;;  %p1143_p11 = scmp.lt.u32.totalorder %s1139_s20, %s1416_s5 }
  0x38   :  { %p1145_p12 = pnand %p1143_p11, %p1140_p10 }
  0x3a   :  { %1148 = shalt.err (!%p1145_p12)
}
  0x3b   :  { %s1149_s1 = scalar_lea.vmem %s1277_s30, 2048  ;;  %p1154_p0 = scmp.lt.s32.totalorder %s1277_s30, %s1277_s30 }
  0x3c   :  { %p1150_p13 = scmp.ne.s32.totalorder %s1277_s30, %s1149_s1  ;;  %p1155_p1 = scmp.lt.s32.totalorder %s1149_s1, %s1149_s1 }
  0x3e   :  { %p1156_p2 = por %p1155_p1, %p1154_p0 }
  0x40   :  { %p1157_p3 = pnand %p1156_p2, %p1150_p13 }
  0x42   :  { %1160 = shalt.err (!%p1157_p3)
}
  0x43   :  { %67 = dma.hbm_to_vmem [thread:$0]  %s1416_s5, 2048, %s1277_s30, [#allocation9], %s1193_s13, %s1193_s13, %s1194_s14  }
  0x44   :  { %1183 = dma.done.wait [#allocation3], 1024  }
  0x45   :  { %1184 = vsyncadd [#allocation3], 4294966272 }
  0x46   :  { %1185 = dma.done.wait [#allocation6], 4096  }
  0x47   :  { %1186 = vsyncadd [#allocation6], 4294963200 }
  0x48   :  { %1187 = dma.done.wait [#allocation9], 2048  }
  0x49   :  { %1188 = vsyncadd [#allocation9], 4294965248  ;;  %v90_v0 = vld [vmem:[#allocation5] sm:$0xff]  ;;  %v91_v1 = vld [vmem:[#allocation5 + $0x8] sm:$0xff] }
  0x4a   :  { %v92_v2 = vld [vmem:[#allocation5 + $0x10] sm:$0xff]  ;;  %v952_v3 = vpack.c.bf16 %v91_v1, %v90_v0  ;;  %v93_v4 = vld [vmem:[#allocation5 + $0x18] sm:$0xff]  ;;  %v94_v6 = vld [vmem:[#allocation5 + $0x20] sm:$0xff] }
  0x4b   :  { %v956_v5 = vpack.c.bf16 %v93_v4, %v92_v2  ;;  %v95_v7 = vld [vmem:[#allocation5 + $0x28] sm:$0xff]  ;;  %v82_v9 = vld [vmem:[#allocation2] sm:$0xff]  ;;  %v96_v10 = vld [vmem:[#allocation5 + $0x30] sm:$0xff] }
  0x4c   :  { %953 = vmatprep.subr.bf16.mxu0 %v952_v3  ;;  %v960_v8 = vpack.c.bf16 %v95_v7, %v94_v6  ;;  %v97_v11 = vld [vmem:[#allocation5 + $0x38] sm:$0xff]  ;;  %852 = vmatprep.mubr.f32.mxu0 %v82_v9  ;;  %v286_v12 = vld [vmem:[#allocation7] sm:$0xff]  ;;  %v287_v13 = vld [vmem:[#allocation7 + $0x8] sm:$0xff] }
  0x4d   :  { %955 = vmatpush3.bf16.msra.mxu0 %v952_v3  ;;  %v288_v14 = vld [vmem:[#allocation7 + $0x10] sm:$0xff]  ;;  %v964_v15 = vpack.c.bf16 %v97_v11, %v96_v10  ;;  %v98_v16 = vld [vmem:[#allocation5 + $0x40] sm:$0xff]  ;;  %v984_v17 = vpack.c.bf16 %v287_v13, %v286_v12  ;;  %v289_v18 = vld [vmem:[#allocation7 + $0x18] sm:$0xff] }
  0x4e   :  { %957 = vmatprep.subr.bf16.mxu0 %v956_v5  ;;  %v99_v19 = vld [vmem:[#allocation5 + $0x48] sm:$0xff]  ;;  %v988_v20 = vpack.c.bf16 %v289_v18, %v288_v14  ;;  %v290_v21 = vld [vmem:[#allocation7 + $0x20] sm:$0xff]  ;;  %v100_v24 = vld [vmem:[#allocation5 + $0x50] sm:$0xff]  ;;  %v1197_v14 = vmov 0.0  }
  0x4f   :  { %v291_v22 = vld [vmem:[#allocation7 + $0x28] sm:$0xff]  ;;  %985 = vmatprep.subr.bf16.mxu1 %v984_v17  ;;  %v968_v23 = vpack.c.bf16 %v99_v19, %v98_v16  ;;  %v101_v26 = vld [vmem:[#allocation5 + $0x58] sm:$0xff]  ;;  %v292_v27 = vld [vmem:[#allocation7 + $0x30] sm:$0xff]  ;;  %v1198_v16 = vmov 1.0  }
  0x50   :  { %987 = vmatpush3.bf16.msra.mxu1 %v984_v17  ;;  %v992_v25 = vpack.c.bf16 %v291_v22, %v290_v21  ;;  %v293_v28 = vld [vmem:[#allocation7 + $0x38] sm:$0xff]  ;;  %v972_v29 = vpack.c.bf16 %v101_v26, %v100_v24  ;;  %v102_v30 = vld [vmem:[#allocation5 + $0x60] sm:$0xff]  ;;  %v103_v32 = vld [vmem:[#allocation5 + $0x68] sm:$0xff] }
  0x51   :  { %959 = vmatpush3.bf16.msra.mxu0 %v956_v5  ;;  %989 = vmatprep.subr.bf16.mxu1 %v988_v20  ;;  %v996_v31 = vpack.c.bf16 %v293_v28, %v292_v27  ;;  %v294_v33 = vld [vmem:[#allocation7 + $0x40] sm:$0xff]  ;;  %v295_v34 = vld [vmem:[#allocation7 + $0x48] sm:$0xff]  ;;  %v976_v35 = vpack.c.bf16 %v103_v32, %v102_v30  ;;  %v104_v37 = vld [vmem:[#allocation5 + $0x70] sm:$0xff] }
  0x52   :  { %961 = vmatprep.subr.bf16.mxu0 %v960_v8  ;;  %v1000_v36 = vpack.c.bf16 %v295_v34, %v294_v33  ;;  %v105_v38 = vld [vmem:[#allocation5 + $0x78] sm:$0xff]  ;;  %v83_v40 = vld [vmem:[#allocation2 + $0x8] sm:$0xff]  ;;  %v84_v41 = vld [vmem:[#allocation2 + $0x10] sm:$0xff] }
  0x53   :  { %v980_v39 = vpack.c.bf16 %v105_v38, %v104_v37  ;;  %v85_v42 = vld [vmem:[#allocation2 + $0x18] sm:$0xff]  ;;  %v86_v43 = vld [vmem:[#allocation2 + $0x20] sm:$0xff]  ;;  %v87_v44 = vld [vmem:[#allocation2 + $0x28] sm:$0xff] }
  0x54   :  { %991 = vmatpush3.bf16.msra.mxu1 %v988_v20  ;;  %v88_v45 = vld [vmem:[#allocation2 + $0x30] sm:$0xff]  ;;  %v89_v46 = vld [vmem:[#allocation2 + $0x38] sm:$0xff]  ;;  %v298_v50 = vld [vmem:[#allocation7 + $0x60] sm:$0xff] }
  0x55   :  { %963 = vmatpush3.bf16.msra.mxu0 %v960_v8  ;;  %993 = vmatprep.subr.bf16.mxu1 %v992_v25  ;;  %v296_v47 = vld [vmem:[#allocation7 + $0x50] sm:$0xff]  ;;  %v297_v48 = vld [vmem:[#allocation7 + $0x58] sm:$0xff]  ;;  %v299_v51 = vld [vmem:[#allocation7 + $0x68] sm:$0xff] }
  0x56   :  { %965 = vmatprep.subr.bf16.mxu0 %v964_v15  ;;  %v1004_v49 = vpack.c.bf16 %v297_v48, %v296_v47  ;;  %v1008_v52 = vpack.c.bf16 %v299_v51, %v298_v50  ;;  %v300_v53 = vld [vmem:[#allocation7 + $0x70] sm:$0xff]  ;;  %v301_v54 = vld [vmem:[#allocation7 + $0x78] sm:$0xff]  ;;  %v482_v56 = vld [vmem:[#allocation8] sm:$0xff] }
  0x57   :  { %v1012_v55 = vpack.c.bf16 %v301_v54, %v300_v53  ;;  %v483_v57 = vld [vmem:[#allocation8 + $0x8] sm:$0xff]  ;;  %v484_v58 = vld [vmem:[#allocation8 + $0x10] sm:$0xff]  ;;  %v485_v60 = vld [vmem:[#allocation8 + $0x18] sm:$0xff] }
  0x58   :  { %995 = vmatpush3.bf16.msra.mxu1 %v992_v25  ;;  %v1016_v59 = vpack.c.bf16 %v483_v57, %v482_v56  ;;  %v1020_v61 = vpack.c.bf16 %v485_v60, %v484_v58  ;;  %v486_v62 = vld [vmem:[#allocation8 + $0x20] sm:$0xff]  ;;  %v487_v63 = vld [vmem:[#allocation8 + $0x28] sm:$0xff]  ;;  %v488_v1 = vld [vmem:[#allocation8 + $0x30] sm:$0xff] }
  0x59   :  { %967 = vmatpush3.bf16.msra.mxu0 %v964_v15  ;;  %997 = vmatprep.subr.bf16.mxu1 %v996_v31  ;;  %v1314_v0 = vpack.c.bf16 %v487_v63, %v486_v62  ;;  %v489_v2 = vld [vmem:[#allocation8 + $0x38] sm:$0xff]  ;;  %v490_v4 = vld [vmem:[#allocation8 + $0x40] sm:$0xff]  ;;  %v491_v5 = vld [vmem:[#allocation8 + $0x48] sm:$0xff] }
  0x5a   :  { %969 = vmatprep.subr.bf16.mxu0 %v968_v23  ;;  %v1317_v3 = vpack.c.bf16 %v489_v2, %v488_v1  ;;  %v1321_v6 = vpack.c.bf16 %v491_v5, %v490_v4  ;;  %v705_v7 = vld [vmem:[%s1413_s2] ss:$0 sm:$0xff] }
  0x5c   :  { %999 = vmatpush3.bf16.msra.mxu1 %v996_v31 }
  0x5d   :  { %971 = vmatpush3.bf16.msra.mxu0 %v968_v23  ;;  %1001 = vmatprep.subr.bf16.mxu1 %v1000_v36 }
  0x5e   :  { %973 = vmatprep.subr.bf16.mxu0 %v972_v29 }
  0x60   :  { %1003 = vmatpush3.bf16.msra.mxu1 %v1000_v36 }
  0x61   :  { %975 = vmatpush3.bf16.msra.mxu0 %v972_v29  ;;  %1005 = vmatprep.subr.bf16.mxu1 %v1004_v49 }
  0x62   :  { %977 = vmatprep.subr.bf16.mxu0 %v976_v35 }
  0x64   :  { %1007 = vmatpush3.bf16.msra.mxu1 %v1004_v49 }
  0x65   :  { %979 = vmatpush3.bf16.msra.mxu0 %v976_v35  ;;  %1009 = vmatprep.subr.bf16.mxu1 %v1008_v52 }
  0x66   :  { %981 = vmatprep.subr.bf16.mxu0 %v980_v39 }
  0x68   :  { %1011 = vmatpush3.bf16.msra.mxu1 %v1008_v52 }
  0x69   :  { %983 = vmatpush3.bf16.msra.mxu0 %v980_v39  ;;  %1013 = vmatprep.subr.bf16.mxu1 %v1012_v55 }
  0x6a   :  { %1017 = vmatprep.subr.bf16.mxu0 %v1016_v59 }
  0x6c   :  { %853 = vmatmul.mubr.f32.vlgmr.msra.gmra.mrb[0].mxu0 %v83_v40  ;;  %1015 = vmatpush3.bf16.msra.mxu1 %v1012_v55 }
  0x6d   :  { %855 = vmatprep.mubr.f32.mxu0 %v84_v41  ;;  %1048 = vmatprep.subr.bf16.mxu1 %v1016_v59 }
  0x6e   :  { %1019 = vmatpush3.bf16.msra.mxu0 %v1016_v59 }
  0x6f   :  { %1021 = vmatprep.subr.bf16.mxu0 %v1020_v61 }
  0x70   :  { %856 = vmatmul.mubr.f32.gmra.mrb[2].mxu0 %v85_v42 }
  0x71   :  { %858 = vmatprep.mubr.f32.mxu0 %v86_v43 }
  0x72   :  { %1023 = vmatpush3.bf16.msra.mxu0 %v1020_v61 }
  0x73   :  { %1025 = vmatprep.subr.bf16.mxu0 %v1314_v0 }
  0x74   :  { %859 = vmatmul.mubr.f32.gmra.mrb[4].mxu0 %v87_v44 }
  0x75   :  { %861 = vmatprep.mubr.f32.mxu0 %v88_v45 }
  0x76   :  { %1027 = vmatpush3.bf16.msra.mxu0 %v1314_v0 }
  0x77   :  { %1029 = vmatprep.subr.bf16.mxu0 %v1317_v3 }
  0x78   :  { %862 = vmatmul.mubr.f32.gmra.mrb[6].mxu0 %v89_v46 }
  0x7a   :  { %1031 = vmatpush3.bf16.msra.mxu0 %v1317_v3 }
  0x7b   :  { %1033 = vmatprep.subr.bf16.mxu0 %v1321_v6 }
  0x7e   :  { %1035 = vmatpush3.bf16.msra.mxu0 %v1321_v6 }
 0x13f   :  { %v854_v8 = vpop.f32.mrb[0].mxu0 }
 0x140   :  { %v179_v9 = vpop.f32.mrb[1].mxu0  ;;  %v185_v11 = vadd.f32 %v854_v8, %v705_v7 }
 0x141   :  { %v180_v10 = vadd.f32 %v705_v7, %v179_v9 }
 0x143   :  { %v223_v12 = vmul.f32 0.5, %v180_v10  ;;  %vm220_vm0 = vcmp.gt.f32.partialorder %v180_v10, 0.5  ;;  %v857_v13 = vpop.f32.mrb[2].mxu0  ;;  %v225_v18 = vmul.f32 0.75, %v180_v10 }
 0x144   :  { %v706_v15 = vsel %vm220_vm0, 1.0, %v1197_v14  ;;  %896 = vmatprep.mubr.msk.f32.mxu1 %vm220_vm0, %v1198_v16  ;;  %v189_v17 = vpop.f32.mrb[3].mxu0  ;;  %v195_v26 = vadd.f32 %v857_v13, %v705_v7 }
 0x145   :  { %v226_v19 = vsub.f32 1.0, %v706_v15  ;;  %v190_v20 = vadd.f32 %v705_v7, %v189_v17  ;;  %v224_v21 = vadd.f32 %v223_v12, %v185_v11  ;;  %v492_v11 = vld [vmem:[#allocation8 + $0x50] sm:$0xff]  ;;  %v493_v12 = vld [vmem:[#allocation8 + $0x58] sm:$0xff]  ;;  %v494_v15 = vld [vmem:[#allocation8 + $0x60] sm:$0xff] }
 0x146   :  { %v1036_v13 = vpack.c.bf16 %v493_v12, %v492_v11  ;;  %v495_v17 = vld [vmem:[#allocation8 + $0x68] sm:$0xff] }
 0x147   :  { %v227_v22 = vmul.f32 %v226_v19, %v225_v18  ;;  %v232_v23 = vmul.f32 0.5, %v224_v21  ;;  %v860_v24 = vpop.f32.mrb[4].mxu0  ;;  %v1040_v18 = vpack.c.bf16 %v495_v17, %v494_v15  ;;  %v496_v19 = vld [vmem:[#allocation8 + $0x70] sm:$0xff] }
 0x148   :  { %v199_v25 = vpop.f32.mrb[5].mxu0  ;;  %v205_v39 = vadd.f32 %v860_v24, %v705_v7  ;;  %1037 = vmatprep.subr.bf16.mxu0 %v1036_v13 }
 0x149   :  { %v233_v27 = vadd.f32 %v232_v23, %v190_v20  ;;  %v228_v28 = vadd.f32 %v227_v22, %v224_v21  ;;  %v200_v35 = vadd.f32 %v705_v7, %v199_v25  ;;  %1039 = vmatpush3.bf16.msra.mxu0 %v1036_v13  ;;  %v497_v20 = vld [vmem:[#allocation8 + $0x78] sm:$0xff]  ;;  %v1353_v22 = vld [vmem:[%s1415_s4] ss:$0 sm:$0xff] }
 0x14a   :  { %1041 = vmatprep.subr.bf16.mxu0 %v1040_v18  ;;  %v1044_v21 = vpack.c.bf16 %v497_v20, %v496_v19 }
 0x14b   :  { %v241_v29 = vmul.f32 0.5, %v233_v27  ;;  %vm229_vm1 = vcmp.gt.f32.partialorder %v228_v28, 0.5  ;;  %v863_v30 = vpop.f32.mrb[6].mxu0  ;;  %v234_v33 = vmul.f32 0.75, %v228_v28 }
 0x14c   :  { %v707_v31 = vsel %vm229_vm1, 1.0, %v1197_v14  ;;  %897 = vmatmul.mubr.msk.f32.vlgmr.msra.gmra.mrb[0].mxu1 %vm229_vm1, %v1198_v16  ;;  %v209_v32 = vpop.f32.mrb[7].mxu0  ;;  %v215_v50 = vadd.f32 %v863_v30, %v705_v7 }
 0x14d   :  { %v235_v34 = vsub.f32 1.0, %v707_v31  ;;  %v242_v36 = vadd.f32 %v241_v29, %v195_v26  ;;  %1056 = vmatpush3.bf16.msra.mxu1 %v1016_v59  ;;  %v210_v46 = vadd.f32 %v705_v7, %v209_v32  ;;  %1043 = vmatpush3.bf16.msra.mxu0 %v1040_v18 }
 0x14e   :  { %1049 = vmatprep.subr.bf16.mxu1 %v1020_v61  ;;  %1045 = vmatprep.subr.bf16.mxu0 %v1044_v21 }
 0x14f   :  { %v236_v37 = vmul.f32 %v235_v34, %v234_v33  ;;  %v250_v38 = vmul.f32 0.5, %v242_v36 }
 0x151   :  { %v251_v40 = vadd.f32 %v250_v38, %v200_v35  ;;  %v237_v41 = vadd.f32 %v236_v37, %v233_v27  ;;  %1057 = vmatpush3.bf16.msra.mxu1 %v1020_v61  ;;  %1047 = vmatpush3.bf16.msra.mxu0 %v1044_v21 }
 0x152   :  { %1050 = vmatprep.subr.bf16.mxu1 %v1314_v0 }
 0x153   :  { %v259_v42 = vmul.f32 0.5, %v251_v40  ;;  %vm238_vm2 = vcmp.gt.f32.partialorder %v237_v41, 0.5  ;;  %v243_v44 = vmul.f32 0.75, %v237_v41 }
 0x154   :  { %v708_v43 = vsel %vm238_vm2, 1.0, %v1197_v14  ;;  %899 = vmatprep.mubr.msk.f32.mxu1 %vm238_vm2, %v1198_v16 }
 0x155   :  { %v244_v45 = vsub.f32 1.0, %v708_v43  ;;  %v260_v47 = vadd.f32 %v259_v42, %v205_v39  ;;  %1058 = vmatpush3.bf16.msra.mxu1 %v1314_v0 }
 0x156   :  { %1051 = vmatprep.subr.bf16.mxu1 %v1317_v3 }
 0x157   :  { %v245_v48 = vmul.f32 %v244_v45, %v243_v44  ;;  %v268_v49 = vmul.f32 0.5, %v260_v47 }
 0x159   :  { %v269_v51 = vadd.f32 %v268_v49, %v210_v46  ;;  %v246_v52 = vadd.f32 %v245_v48, %v242_v36  ;;  %1059 = vmatpush3.bf16.msra.mxu1 %v1317_v3 }
 0x15a   :  { %1052 = vmatprep.subr.bf16.mxu1 %v1321_v6 }
 0x15b   :  { %v277_v53 = vmul.f32 0.5, %v269_v51  ;;  %vm247_vm3 = vcmp.gt.f32.partialorder %v246_v52, 0.5  ;;  %v252_v55 = vmul.f32 0.75, %v246_v52 }
 0x15c   :  { %v709_v54 = vsel %vm247_vm3, 1.0, %v1197_v14  ;;  %900 = vmatmul.mubr.msk.f32.gmra.mrb[2].mxu1 %vm247_vm3, %v1198_v16 }
 0x15d   :  { %v253_v56 = vsub.f32 1.0, %v709_v54  ;;  %v278_v57 = vadd.f32 %v277_v53, %v215_v50  ;;  %1060 = vmatpush3.bf16.msra.mxu1 %v1321_v6 }
 0x15e   :  { %1053 = vmatprep.subr.bf16.mxu1 %v1036_v13 }
 0x15f   :  { %v254_v58 = vmul.f32 %v253_v56, %v252_v55 }
 0x161   :  { %v255_v59 = vadd.f32 %v254_v58, %v251_v40  ;;  %1061 = vmatpush3.bf16.msra.mxu1 %v1036_v13 }
 0x162   :  { %1054 = vmatprep.subr.bf16.mxu1 %v1040_v18 }
 0x163   :  { %vm256_vm4 = vcmp.gt.f32.partialorder %v255_v59, 0.5  ;;  %v261_v61 = vmul.f32 0.75, %v255_v59 }
 0x164   :  { %v710_v60 = vsel %vm256_vm4, 1.0, %v1197_v14  ;;  %902 = vmatprep.mubr.msk.f32.mxu1 %vm256_vm4, %v1198_v16 }
 0x165   :  { %v262_v62 = vsub.f32 1.0, %v710_v60  ;;  %1062 = vmatpush3.bf16.msra.mxu1 %v1040_v18 }
 0x166   :  { %1055 = vmatprep.subr.bf16.mxu1 %v1044_v21 }
 0x167   :  { %v263_v63 = vmul.f32 %v262_v62, %v261_v61 }
 0x169   :  { %v264_v0 = vadd.f32 %v263_v63, %v260_v47  ;;  %1063 = vmatpush3.bf16.msra.mxu1 %v1044_v21 }
 0x16b   :  { %vm265_vm5 = vcmp.gt.f32.partialorder %v264_v0, 0.5  ;;  %v270_v2 = vmul.f32 0.75, %v264_v0 }
 0x16c   :  { %v711_v1 = vsel %vm265_vm5, 1.0, %v1197_v14  ;;  %903 = vmatmul.mubr.msk.f32.gmra.mrb[4].mxu1 %vm265_vm5, %v1198_v16 }
 0x16d   :  { %v271_v3 = vsub.f32 1.0, %v711_v1 }
 0x16f   :  { %v272_v4 = vmul.f32 %v271_v3, %v270_v2 }
 0x171   :  { %v273_v5 = vadd.f32 %v272_v4, %v269_v51 }
 0x173   :  { %vm274_vm6 = vcmp.gt.f32.partialorder %v273_v5, 0.5  ;;  %v279_v7 = vmul.f32 0.75, %v273_v5 }
 0x174   :  { %v712_v6 = vsel %vm274_vm6, 1.0, %v1197_v14  ;;  %905 = vmatprep.mubr.msk.f32.mxu1 %vm274_vm6, %v1198_v16 }
 0x175   :  { %v280_v8 = vsub.f32 1.0, %v712_v6 }
 0x177   :  { %v281_v9 = vmul.f32 %v280_v8, %v279_v7 }
 0x179   :  { %v282_v10 = vadd.f32 %v281_v9, %v278_v57 }
 0x17b   :  { %vm283_vm7 = vcmp.gt.f32.partialorder %v282_v10, 0.5 }
 0x17c   :  { %906 = vmatmul.mubr.msk.f32.gmra.mrb[6].mxu1 %vm283_vm7, %v1198_v16 }
 0x21f   :  { %v898_v23 = vpop.f32.mrb[0].mxu1 }
 0x220   :  { %v375_v24 = vpop.f32.mrb[1].mxu1  ;;  %v381_v26 = vadd.f32 %v898_v23, %v1353_v22 }
 0x221   :  { %v376_v25 = vadd.f32 %v1353_v22, %v375_v24 }
 0x223   :  { %v419_v27 = vmul.f32 0.5, %v376_v25  ;;  %vm416_vm8 = vcmp.gt.f32.partialorder %v376_v25, 0.5  ;;  %v421_v30 = vmul.f32 0.75, %v376_v25 }
 0x224   :  { %v723_v28 = vsel %vm416_vm8, 1.0, %v1197_v14  ;;  %940 = vmatprep.mubr.msk.f32.mxu0 %vm416_vm8, %v1198_v16 }
 0x225   :  { %v420_v29 = vadd.f32 %v419_v27, %v381_v26  ;;  %v422_v31 = vsub.f32 1.0, %v723_v28  ;;  %v1381_v27 = vld [vmem:[%s1417_s6] ss:$0 sm:$0xff]  ;;  %s1199_s6 = smov [#allocation10]  }
 0x226   :  { %s694_s28 = sshll.u32 %s1199_s6, 4  ;;  %s695_s28 = int_to_ptr.vmem [resolvable:$true] %s694_s28 }
 0x227   :  { %v423_v32 = vmul.f32 %v422_v31, %v421_v30  ;;  %v428_v39 = vmul.f32 0.5, %v420_v29  ;;  %s1161_s29 = scalar_lea.vmem %s695_s28, 128  ;;  %p1166_p5 = scmp.lt.s32.totalorder %s695_s28, %s695_s28 }
 0x228   :  { %p1162_p4 = scmp.ne.s32.totalorder %s695_s28, %s1161_s29  ;;  %p1167_p6 = scmp.lt.s32.totalorder %s1161_s29, %s1161_s29 }
 0x229   :  { %v424_v33 = vadd.f32 %v423_v32, %v420_v29 }
 0x22a   :  { %p1168_p7 = por %p1167_p6, %p1166_p5 }
 0x22b   :  { %vm425_vm9 = vcmp.gt.f32.partialorder %v424_v33, 0.5  ;;  %v430_v40 = vmul.f32 0.75, %v424_v33 }
 0x22c   :  { %941 = vmatmul.mubr.msk.f32.vlgmr.msra.gmra.mrb[8].mxu0 %vm425_vm9, %v1198_v16  ;;  %v724_v34 = vsel %vm425_vm9, 1.0, %v1197_v14  ;;  %p1169_p8 = pnand %p1168_p7, %p1162_p4 }
 0x22d   :  { %v431_v36 = vsub.f32 1.0, %v724_v34 }
 0x22f   :  { %v901_v35 = vpop.f32.mrb[2].mxu1  ;;  %v432_v42 = vmul.f32 %v431_v36, %v430_v40 }
 0x230   :  { %v385_v37 = vpop.f32.mrb[3].mxu1  ;;  %v391_v43 = vadd.f32 %v901_v35, %v1353_v22 }
 0x231   :  { %v386_v38 = vadd.f32 %v1353_v22, %v385_v37 }
 0x233   :  { %v429_v41 = vadd.f32 %v428_v39, %v386_v38 }
 0x235   :  { %v433_v44 = vadd.f32 %v432_v42, %v429_v41  ;;  %v437_v45 = vmul.f32 0.5, %v429_v41 }
 0x237   :  { %vm434_vm10 = vcmp.gt.f32.partialorder %v433_v44, 0.5  ;;  %v438_v46 = vadd.f32 %v437_v45, %v391_v43  ;;  %v439_v48 = vmul.f32 0.75, %v433_v44 }
 0x238   :  { %v725_v47 = vsel %vm434_vm10, 1.0, %v1197_v14  ;;  %943 = vmatprep.mubr.msk.f32.mxu0 %vm434_vm10, %v1198_v16 }
 0x239   :  { %v440_v49 = vsub.f32 1.0, %v725_v47  ;;  %v446_v56 = vmul.f32 0.5, %v438_v46 }
 0x23b   :  { %v441_v50 = vmul.f32 %v440_v49, %v439_v48 }
 0x23d   :  { %v442_v51 = vadd.f32 %v441_v50, %v438_v46 }
 0x23f   :  { %v904_v52 = vpop.f32.mrb[4].mxu1  ;;  %vm443_vm11 = vcmp.gt.f32.partialorder %v442_v51, 0.5  ;;  %v448_v57 = vmul.f32 0.75, %v442_v51 }
 0x240   :  { %v395_v53 = vpop.f32.mrb[5].mxu1  ;;  %v726_v54 = vsel %vm443_vm11, 1.0, %v1197_v14  ;;  %944 = vmatmul.mubr.msk.f32.gmra.mrb[10].mxu0 %vm443_vm11, %v1198_v16  ;;  %v401_v61 = vadd.f32 %v904_v52, %v1353_v22 }
 0x241   :  { %v396_v55 = vadd.f32 %v1353_v22, %v395_v53  ;;  %v449_v58 = vsub.f32 1.0, %v726_v54 }
 0x243   :  { %v447_v59 = vadd.f32 %v446_v56, %v396_v55  ;;  %v450_v60 = vmul.f32 %v449_v58, %v448_v57 }
 0x245   :  { %v455_v62 = vmul.f32 0.5, %v447_v59  ;;  %v451_v63 = vadd.f32 %v450_v60, %v447_v59 }
 0x247   :  { %vm452_vm12 = vcmp.gt.f32.partialorder %v451_v63, 0.5  ;;  %v456_v0 = vadd.f32 %v455_v62, %v401_v61  ;;  %v457_v2 = vmul.f32 0.75, %v451_v63 }
 0x248   :  { %v727_v1 = vsel %vm452_vm12, 1.0, %v1197_v14  ;;  %946 = vmatprep.mubr.msk.f32.mxu1 %vm452_vm12, %v1198_v16 }
 0x249   :  { %v458_v3 = vsub.f32 1.0, %v727_v1  ;;  %v464_v10 = vmul.f32 0.5, %v456_v0 }
 0x24b   :  { %v459_v4 = vmul.f32 %v458_v3, %v457_v2 }
 0x24d   :  { %v460_v5 = vadd.f32 %v459_v4, %v456_v0 }
 0x24f   :  { %v907_v6 = vpop.f32.mrb[6].mxu1  ;;  %vm461_vm13 = vcmp.gt.f32.partialorder %v460_v5, 0.5  ;;  %v466_v11 = vmul.f32 0.75, %v460_v5 }
 0x250   :  { %v405_v7 = vpop.f32.mrb[7].mxu1  ;;  %v728_v8 = vsel %vm461_vm13, 1.0, %v1197_v14  ;;  %947 = vmatmul.mubr.msk.f32.vlgmr.msra.gmra.mrb[8].mxu1 %vm461_vm13, %v1198_v16  ;;  %v411_v17 = vadd.f32 %v907_v6, %v1353_v22 }
 0x251   :  { %v406_v9 = vadd.f32 %v1353_v22, %v405_v7  ;;  %v467_v12 = vsub.f32 1.0, %v728_v8 }
 0x253   :  { %v465_v13 = vadd.f32 %v464_v10, %v406_v9  ;;  %v468_v15 = vmul.f32 %v467_v12, %v466_v11 }
 0x255   :  { %v469_v18 = vadd.f32 %v468_v15, %v465_v13  ;;  %v473_v19 = vmul.f32 0.5, %v465_v13 }
 0x257   :  { %vm470_vm14 = vcmp.gt.f32.partialorder %v469_v18, 0.5  ;;  %v474_v20 = vadd.f32 %v473_v19, %v411_v17  ;;  %v475_v23 = vmul.f32 0.75, %v469_v18 }
 0x258   :  { %v729_v21 = vsel %vm470_vm14, 1.0, %v1197_v14  ;;  %949 = vmatprep.mubr.msk.f32.mxu1 %vm470_vm14, %v1198_v16 }
 0x259   :  { %v476_v24 = vsub.f32 1.0, %v729_v21 }
 0x25b   :  { %v477_v25 = vmul.f32 %v476_v24, %v475_v23 }
 0x25d   :  { %v478_v26 = vadd.f32 %v477_v25, %v474_v20 }
 0x25f   :  { %vm479_vm15 = vcmp.gt.f32.partialorder %v478_v26, 0.5 }
 0x260   :  { %950 = vmatmul.mubr.msk.f32.gmra.mrb[10].mxu1 %vm479_vm15, %v1198_v16 }
 0x2ff   :  { %v942_v22 = vpop.f32.mrb[8].mxu0 }
 0x300   :  { %v571_v28 = vpop.f32.mrb[9].mxu0  ;;  %v577_v30 = vadd.f32 %v942_v22, %v1381_v27 }
 0x301   :  { %v572_v29 = vadd.f32 %v1381_v27, %v571_v28 }
 0x303   :  { %vm612_vm0 = vcmp.gt.f32.partialorder %v572_v29, 0.5  ;;  %v616_v31 = vmul.f32 0.5, %v572_v29  ;;  %v618_v33 = vmul.f32 0.75, %v572_v29 }
 0x304   :  { %v740_v32 = vsel %vm612_vm0, 1.0, %v1197_v14 }
 0x305   :  { %v619_v34 = vsub.f32 1.0, %v740_v32  ;;  %v617_v35 = vadd.f32 %v616_v31, %v577_v30 }
 0x307   :  { %v620_v36 = vmul.f32 %v619_v34, %v618_v33  ;;  %v626_v43 = vmul.f32 0.5, %v617_v35 }
 0x309   :  { %v621_v16 = vadd.f32 %v620_v36, %v617_v35 }
 0x30b   :  { %vm622_vm1 = vcmp.gt.f32.partialorder %v621_v16, 0.5  ;;  %v628_v44 = vmul.f32 0.75, %v621_v16 }
 0x30c   :  { %v741_v37 = vsel %vm622_vm1, 1.0, %v1197_v14 }
 0x30d   :  { %v625_v38 = vadd.f32 %v741_v37, %v740_v32  ;;  %v629_v40 = vsub.f32 1.0, %v741_v37 }
 0x30f   :  { %v630_v46 = vmul.f32 %v629_v40, %v628_v44 }
 0x313   :  { %v945_v39 = vpop.f32.mrb[10].mxu0 }
 0x314   :  { %v581_v41 = vpop.f32.mrb[11].mxu0  ;;  %v587_v47 = vadd.f32 %v945_v39, %v1381_v27 }
 0x315   :  { %v582_v42 = vadd.f32 %v1381_v27, %v581_v41 }
 0x317   :  { %v627_v45 = vadd.f32 %v626_v43, %v582_v42 }
 0x319   :  { %v631_v48 = vadd.f32 %v630_v46, %v627_v45  ;;  %v636_v49 = vmul.f32 0.5, %v627_v45 }
 0x31b   :  { %vm632_vm2 = vcmp.gt.f32.partialorder %v631_v48, 0.5  ;;  %v637_v50 = vadd.f32 %v636_v49, %v587_v47  ;;  %v638_v53 = vmul.f32 0.75, %v631_v48 }
 0x31c   :  { %v742_v51 = vsel %vm632_vm2, 1.0, %v1197_v14 }
 0x31d   :  { %v635_v52 = vadd.f32 %v742_v51, %v625_v38  ;;  %v639_v54 = vsub.f32 1.0, %v742_v51  ;;  %v646_v60 = vmul.f32 0.5, %v637_v50 }
 0x31f   :  { %v640_v55 = vmul.f32 %v639_v54, %v638_v53 }
 0x321   :  { %v641_v56 = vadd.f32 %v640_v55, %v637_v50 }
 0x323   :  { %v948_v57 = vpop.f32.mrb[8].mxu1  ;;  %vm642_vm3 = vcmp.gt.f32.partialorder %v641_v56, 0.5  ;;  %v648_v63 = vmul.f32 0.75, %v641_v56 }
 0x324   :  { %v591_v58 = vpop.f32.mrb[9].mxu1  ;;  %v743_v59 = vsel %vm642_vm3, 1.0, %v1197_v14  ;;  %v597_v3 = vadd.f32 %v948_v57, %v1381_v27 }
 0x325   :  { %v592_v61 = vadd.f32 %v1381_v27, %v591_v58  ;;  %v645_v62 = vadd.f32 %v743_v59, %v635_v52  ;;  %v649_v0 = vsub.f32 1.0, %v743_v59 }
 0x327   :  { %v647_v1 = vadd.f32 %v646_v60, %v592_v61  ;;  %v650_v2 = vmul.f32 %v649_v0, %v648_v63 }
 0x329   :  { %v651_v4 = vadd.f32 %v650_v2, %v647_v1  ;;  %v656_v5 = vmul.f32 0.5, %v647_v1 }
 0x32b   :  { %vm652_vm4 = vcmp.gt.f32.partialorder %v651_v4, 0.5  ;;  %v657_v6 = vadd.f32 %v656_v5, %v597_v3  ;;  %v658_v9 = vmul.f32 0.75, %v651_v4 }
 0x32c   :  { %v744_v7 = vsel %vm652_vm4, 1.0, %v1197_v14 }
 0x32d   :  { %v655_v8 = vadd.f32 %v744_v7, %v645_v62  ;;  %v659_v10 = vsub.f32 1.0, %v744_v7  ;;  %v666_v18 = vmul.f32 0.5, %v657_v6 }
 0x32f   :  { %v660_v11 = vmul.f32 %v659_v10, %v658_v9 }
 0x331   :  { %v661_v12 = vadd.f32 %v660_v11, %v657_v6 }
 0x333   :  { %v951_v13 = vpop.f32.mrb[10].mxu1  ;;  %vm662_vm5 = vcmp.gt.f32.partialorder %v661_v12, 0.5  ;;  %v668_v20 = vmul.f32 0.75, %v661_v12 }
 0x334   :  { %v601_v15 = vpop.f32.mrb[11].mxu1  ;;  %v745_v17 = vsel %vm662_vm5, 1.0, %v1197_v14  ;;  %v607_v26 = vadd.f32 %v951_v13, %v1381_v27 }
 0x335   :  { %v602_v19 = vadd.f32 %v1381_v27, %v601_v15  ;;  %v669_v21 = vsub.f32 1.0, %v745_v17  ;;  %v665_v23 = vadd.f32 %v745_v17, %v655_v8 }
 0x337   :  { %v667_v24 = vadd.f32 %v666_v18, %v602_v19  ;;  %v670_v25 = vmul.f32 %v669_v21, %v668_v20 }
 0x339   :  { %v671_v22 = vadd.f32 %v670_v25, %v667_v24  ;;  %v676_v28 = vmul.f32 0.5, %v667_v24 }
 0x33b   :  { %vm672_vm6 = vcmp.gt.f32.partialorder %v671_v22, 0.5  ;;  %v677_v29 = vadd.f32 %v676_v28, %v607_v26  ;;  %v678_v31 = vmul.f32 0.75, %v671_v22 }
 0x33c   :  { %v746_v30 = vsel %vm672_vm6, 1.0, %v1197_v14 }
 0x33d   :  { %v675_v32 = vadd.f32 %v746_v30, %v665_v23  ;;  %v679_v33 = vsub.f32 1.0, %v746_v30 }
 0x33f   :  { %v680_v34 = vmul.f32 %v679_v33, %v678_v31 }
 0x341   :  { %v681_v35 = vadd.f32 %v680_v34, %v677_v29 }
 0x343   :  { %vm682_vm7 = vcmp.gt.f32.partialorder %v681_v35, 0.5 }
 0x344   :  { %v747_v36 = vsel %vm682_vm7, 1.0, %v1197_v14 }
 0x345   :  { %v685_v16 = vadd.f32 %v747_v36, %v675_v32 }
 0x347   :  { %v686_v37 = vmul.f32 0.125, %v685_v16 }
 0x349   :  { %687 = vst [vmem:[#allocation10] sm:$0xff] %v686_v37 }
 0x34a   :  { %1172 = shalt.err (!%p1169_p8)
}
 0x34b   :  { %s1173_s9 = scalar_lea.hbm %s1418_s7, 128 }
 0x34c   :  { %p1174_p9 = scmp.ne.s32.totalorder %s1418_s7, %s1173_s9  ;;  %p1177_p10 = scmp.lt.u32.totalorder %s1173_s9, %s1418_s7 }
 0x34e   :  { %p1179_p11 = pnand %p1177_p10, %p1174_p9 }
 0x350   :  { %1182 = shalt.err (!%p1179_p11)
}
 0x351   :  { %697 = dma.vmem_to_hbm [thread:$0]  %s695_s28, 128, %s1418_s7, [#allocation4]  }
 0x352   :  { %1189 = dma.done.wait [#allocation4], 128  }
 0x353   :  { %1190 = vsyncadd [#allocation4], 4294967168 }
 0x354   :  { %701 = vsyncpa [#allocation3], 1 }
 0x355   :  { %702 = vsyncpa [#allocation6], 1 }
 0x356   :  { %703 = vsyncpa [#allocation9], 1 }
 0x357   :  { %704 = vsyncpa [#allocation4], 1 }

</bundles_post_ra>
